<compile_context>
chip_gen: v7x
topology: tpu7x:2x2x1
jax: 0.10.0
libtpu: 0.0.40
codegen_flags: <defaults>
</compile_context>

<pallas_src>
import functools

import jax
import jax.numpy as jnp
from jax.experimental import pallas as pl
from jax.experimental.pallas import tpu as pltpu

LANES = 128
SUBLANES = 8
MAX_TILE_ROWS = 1024   # (1024,128) f32 block = 512 KiB; ~4 MiB total VMEM use
NUM_CORES = 2          # v7x has 2 TCs; harmless (sequential) on v5e/v6e


# ---------------------------------------------------------------------------
# Kernel: fused BCE-sum + L1-sum over a phase-split tile sequence.
#   tiles [0, n_pred_tiles)            -> BCE phase (predictions/targets)
#   tiles [n_pred_tiles, n_total_tiles)-> L1 phase (flattened params)
# ---------------------------------------------------------------------------
def _fused_loss_kernel(
    p_ref, t_ref, w_ref, bce_out_ref, l1_out_ref, bce_acc, l1_acc,
    *, n_pred_tiles, n_total_tiles, tiles_per_core,
):
    c = pl.program_id(0)          # core shard (parallel)
    j = pl.program_id(1)          # tile within this core (arbitrary/reduction)
    tile_id = c * tiles_per_core + j

    @pl.when(j == 0)
    def _():
        bce_acc[...] = jnp.zeros_like(bce_acc)
        l1_acc[...] = jnp.zeros_like(l1_acc)

    @pl.when(tile_id < n_pred_tiles)
    def _():
        p = p_ref[...].astype(jnp.float32)
        t = t_ref[...].astype(jnp.float32)
        # Match torch.nn.functional.binary_cross_entropy: log terms clamped
        # at -100.  Two logs kept so soft (non-binary) targets stay correct.
        # TODO(synk): if targets are guaranteed hard 0/1, a single
        # log(where(t>0.5, p, 1-p)) halves EUP work.
        log_p = jnp.maximum(jnp.log(p), -100.0)
        log_1mp = jnp.maximum(jnp.log(1.0 - p), -100.0)
        bce_acc[...] += -(t * log_p + (1.0 - t) * log_1mp)

    @pl.when((tile_id >= n_pred_tiles) & (tile_id < n_total_tiles))
    def _():
        l1_acc[...] += jnp.abs(w_ref[...].astype(jnp.float32))

    @pl.when(j == pl.num_programs(1) - 1)
    def _():
        # Fold the tile-shaped accumulator down to a lane-dense (8,128)
        # partial; the final (tiny) reduction happens in the wrapper.
        bce_out_ref[0] = bce_acc[...].reshape(-1, SUBLANES, LANES).sum(axis=0)
        l1_out_ref[0] = l1_acc[...].reshape(-1, SUBLANES, LANES).sum(axis=0)


# ---------------------------------------------------------------------------
# Host-side helpers
# ---------------------------------------------------------------------------
def _tile_rows_for(n_elems):
    """Rows per block: round up to a multiple of 8, cap at MAX_TILE_ROWS."""
    rows = -(-n_elems // LANES)
    rows = -(-rows // SUBLANES) * SUBLANES
    return min(MAX_TILE_ROWS, rows)


def _to_lane_slab(x_flat, tile_rows):
    """Zero-pad a flat vector to a multiple of tile_rows*128, reshape (R,128)."""
    n = x_flat.shape[0]
    block = tile_rows * LANES
    pad = (-n) % block
    if pad:
        x_flat = jnp.concatenate([x_flat, jnp.zeros((pad,), x_flat.dtype)])
    return x_flat.reshape(-1, LANES)


@functools.partial(jax.jit, static_argnames=("weight",))
def custom_loss(predictions, targets, params, weight=0.01):
    """total = mean BCE(predictions, targets) + weight * sum_p sum(|p|)."""
    n_elems = predictions.size

    # Keep native dtypes in HBM; the kernel casts to f32 on the fly.
    tp = _tile_rows_for(n_elems)
    p_slab = _to_lane_slab(predictions.reshape(-1), tp)
    t_slab = _to_lane_slab(targets.reshape(-1), tp)
    # NOTE: padding predictions/targets with zeros contributes exactly 0 to
    # the BCE sum (t=0 and log(1-0)=0), and abs(0)=0 for the L1 padding.

    # NOTE: for model-scale parameter counts, pass per-param slabs (or
    # scalar-prefetched offsets) instead of concatenating to avoid an extra
    # HBM copy; fine for this toy MLP.
    flat_params = jnp.concatenate([p.reshape(-1) for p in params])
    tq = _tile_rows_for(flat_params.shape[0])
    w_slab = _to_lane_slab(flat_params, tq)

    n_pred_tiles = p_slab.shape[0] // tp
    n_param_tiles = w_slab.shape[0] // tq
    n_total_tiles = n_pred_tiles + n_param_tiles
    tiles_per_core = -(-n_total_tiles // NUM_CORES)

    kernel = functools.partial(
        _fused_loss_kernel,
        n_pred_tiles=n_pred_tiles,
        n_total_tiles=n_total_tiles,
        tiles_per_core=tiles_per_core,
    )

    def pred_map(c, j):
        tid = c * tiles_per_core + j
        return (jnp.minimum(tid, n_pred_tiles - 1), 0)

    def param_map(c, j):
        tid = c * tiles_per_core + j
        return (jnp.clip(tid - n_pred_tiles, 0, n_param_tiles - 1), 0)

    out_map = lambda c, j: (c, 0, 0)

    bce_part, l1_part = pl.pallas_call(
        kernel,
        out_shape=(
            jax.ShapeDtypeStruct((NUM_CORES, SUBLANES, LANES), jnp.float32),
            jax.ShapeDtypeStruct((NUM_CORES, SUBLANES, LANES), jnp.float32),
        ),
        grid_spec=pltpu.PrefetchScalarGridSpec(
            num_scalar_prefetch=0,
            grid=(NUM_CORES, tiles_per_core),
            in_specs=[
                pl.BlockSpec((tp, LANES), pred_map),
                pl.BlockSpec((tp, LANES), pred_map),
                pl.BlockSpec((tq, LANES), param_map),
            ],
            out_specs=[
                pl.BlockSpec((1, SUBLANES, LANES), out_map),
                pl.BlockSpec((1, SUBLANES, LANES), out_map),
            ],
            scratch_shapes=[
                pltpu.VMEM((tp, LANES), jnp.float32),
                pltpu.VMEM((tq, LANES), jnp.float32),
            ],
        ),
        compiler_params=pltpu.CompilerParams(
            dimension_semantics=("parallel", "arbitrary"),
        ),
    )(p_slab, t_slab, w_slab)

    bce_loss = jnp.sum(bce_part) / jnp.float32(n_elems)
    l1_sum = jnp.sum(l1_part)
    return bce_loss + jnp.float32(weight) * l1_sum


# ---------------------------------------------------------------------------
# Main
# ---------------------------------------------------------------------------
if __name__ == "__main__":
    key = jax.random.PRNGKey(0)
    k_pred, k_tgt, k_w1, k_b1, k_w2, k_b2 = jax.random.split(key, 6)

    # Predictions in (0, 1) (post-sigmoid), NCHW layout: (B=2, C=4, H=16, W=16)
    predictions = jax.nn.sigmoid(
        jax.random.normal(k_pred, (2, 4, 16, 16), dtype=jnp.float32)
    )
    targets = jax.random.bernoulli(k_tgt, 0.5, (2, 4, 16, 16)).astype(
        jnp.float32
    )

    # Deterministic synthetic "model" parameters (a small MLP: 16->32->1),
    # mirroring model.parameters() in the PyTorch forward.
    params = [
        0.1 * jax.random.normal(k_w1, (32, 16), dtype=jnp.float32),  # W1
        0.1 * jax.random.normal(k_b1, (32,), dtype=jnp.float32),     # b1
        0.1 * jax.random.normal(k_w2, (1, 32), dtype=jnp.float32),   # W2
        0.1 * jax.random.normal(k_b2, (1,), dtype=jnp.float32),      # b2
    ]

    total = custom_loss(predictions, targets, params, weight=0.01)
    jax.block_until_ready(total)

    # Reference check (plain JAX) for correctness.
    log_p = jnp.maximum(jnp.log(predictions), -100.0)
    log_1mp = jnp.maximum(jnp.log(1.0 - predictions), -100.0)
    bce_ref = jnp.mean(-(targets * log_p + (1.0 - targets) * log_1mp))
    l1_ref = sum(jnp.sum(jnp.abs(p)) for p in params)
    ref = bce_ref + 0.01 * l1_ref
    assert jnp.allclose(total, ref, rtol=1e-5, atol=1e-5), (total, ref)

    print("KERNEL_OK")
</pallas_src>

<mosaic_0001>
module attributes {stable_mosaic.version = 11 : i64} {
  func.func @_fused_loss_kernel(%arg0: i32, %arg1: i32, %arg2: memref<16x128xf32, #tpu.memory_space<vmem>>, %arg3: memref<16x128xf32, #tpu.memory_space<vmem>>, %arg4: memref<8x128xf32, #tpu.memory_space<vmem>>, %arg5: memref<1x8x128xf32, #tpu.memory_space<vmem>>, %arg6: memref<1x8x128xf32, #tpu.memory_space<vmem>>, %arg7: memref<16x128xf32, #tpu.memory_space<vmem>>, %arg8: memref<8x128xf32, #tpu.memory_space<vmem>>) attributes {dimension_semantics = [#tpu.dimension_semantics<parallel>, #tpu.dimension_semantics<arbitrary>], iteration_bounds = array<i64: 2, 1>, scalar_prefetch = 0 : i64, scratch_operands = 2 : i64, tpu.core_type = #tpu.core_type<tc>, window_params = [{transform_indices = @transform_0, window_bounds = array<i64: 16, 128>}, {transform_indices = @transform_1, window_bounds = array<i64: 16, 128>}, {transform_indices = @transform_2, window_bounds = array<i64: 8, 128>}, {transform_indices = @transform_3, window_bounds = array<i64: 1, 8, 128>}, {transform_indices = @transform_4, window_bounds = array<i64: 1, 8, 128>}]} {
    %c1_i32 = arith.constant 1 : i32
    %0 = arith.muli %arg0, %c1_i32 : i32
    %1 = arith.addi %0, %arg1 : i32
    %c0_i32 = arith.constant 0 : i32
    %2 = arith.cmpi eq, %arg1, %c0_i32 : i32
    %3 = arith.extui %2 : i1 to i32
    %c0_i32_0 = arith.constant 0 : i32
    %4 = arith.cmpi ne, %3, %c0_i32_0 : i32
    scf.if %4 {
      %cst = arith.constant 0.000000e+00 : f32
      %16 = vector.broadcast %cst : f32 to vector<16x128xf32>
      %c0 = arith.constant 0 : index
      %c0_7 = arith.constant 0 : index
      %17 = vector.load %arg7[%c0, %c0_7] : memref<16x128xf32, #tpu.memory_space<vmem>>, vector<16x128xf32>
      tpu.vector_store %arg7[%c0, %c0_7], %16 {strides = array<i32>} : memref<16x128xf32, #tpu.memory_space<vmem>>, vector<16x128xf32>,
      %cst_8 = arith.constant 0.000000e+00 : f32
      %18 = vector.broadcast %cst_8 : f32 to vector<8x128xf32>
      %c0_9 = arith.constant 0 : index
      %c0_10 = arith.constant 0 : index
      %19 = vector.load %arg8[%c0_9, %c0_10] : memref<8x128xf32, #tpu.memory_space<vmem>>, vector<8x128xf32>
      tpu.vector_store %arg8[%c0_9, %c0_10], %18 {strides = array<i32>} : memref<8x128xf32, #tpu.memory_space<vmem>>, vector<8x128xf32>,
    } else {
    }
    %c1_i32_1 = arith.constant 1 : i32
    %5 = arith.cmpi slt, %1, %c1_i32_1 : i32
    %6 = arith.extui %5 : i1 to i32
    %c0_i32_2 = arith.constant 0 : i32
    %7 = arith.cmpi ne, %6, %c0_i32_2 : i32
    scf.if %7 {
      %c0 = arith.constant 0 : index
      %c0_7 = arith.constant 0 : index
      %16 = vector.load %arg2[%c0, %c0_7] : memref<16x128xf32, #tpu.memory_space<vmem>>, vector<16x128xf32>
      %c0_8 = arith.constant 0 : index
      %c0_9 = arith.constant 0 : index
      %17 = vector.load %arg3[%c0_8, %c0_9] : memref<16x128xf32, #tpu.memory_space<vmem>>, vector<16x128xf32>
      %18 = math.log %16 : vector<16x128xf32>
      %cst = arith.constant -1.000000e+02 : f32
      %19 = vector.broadcast %cst : f32 to vector<16x128xf32>
      %20 = arith.maximumf %18, %19 : vector<16x128xf32>
      %cst_10 = arith.constant 1.000000e+00 : f32
      %21 = vector.broadcast %cst_10 : f32 to vector<16x128xf32>
      %22 = arith.subf %21, %16 : vector<16x128xf32>
      %23 = math.log %22 : vector<16x128xf32>
      %cst_11 = arith.constant -1.000000e+02 : f32
      %24 = vector.broadcast %cst_11 : f32 to vector<16x128xf32>
      %25 = arith.maximumf %23, %24 : vector<16x128xf32>
      %c0_12 = arith.constant 0 : index
      %c0_13 = arith.constant 0 : index
      %26 = vector.load %arg7[%c0_12, %c0_13] : memref<16x128xf32, #tpu.memory_space<vmem>>, vector<16x128xf32>
      %27 = arith.mulf %17, %20 : vector<16x128xf32>
      %cst_14 = arith.constant 1.000000e+00 : f32
      %28 = vector.broadcast %cst_14 : f32 to vector<16x128xf32>
      %29 = arith.subf %28, %17 : vector<16x128xf32>
      %30 = arith.mulf %29, %25 : vector<16x128xf32>
      %31 = arith.addf %27, %30 : vector<16x128xf32>
      %cst_15 = arith.constant 0.000000e+00 : f32
      %32 = vector.broadcast %cst_15 : f32 to vector<16x128xf32>
      %33 = arith.subf %32, %31 : vector<16x128xf32>
      %34 = arith.addf %26, %33 : vector<16x128xf32>
      %c0_16 = arith.constant 0 : index
      %c0_17 = arith.constant 0 : index
      %35 = vector.load %arg7[%c0_16, %c0_17] : memref<16x128xf32, #tpu.memory_space<vmem>>, vector<16x128xf32>
      tpu.vector_store %arg7[%c0_16, %c0_17], %34 {strides = array<i32>} : memref<16x128xf32, #tpu.memory_space<vmem>>, vector<16x128xf32>,
    } else {
    }
    %c1_i32_3 = arith.constant 1 : i32
    %8 = arith.cmpi sge, %1, %c1_i32_3 : i32
    %c2_i32 = arith.constant 2 : i32
    %9 = arith.cmpi slt, %1, %c2_i32 : i32
    %10 = arith.andi %8, %9 : i1
    %11 = arith.extui %10 : i1 to i32
    %c0_i32_4 = arith.constant 0 : i32
    %12 = arith.cmpi ne, %11, %c0_i32_4 : i32
    scf.if %12 {
      %c0 = arith.constant 0 : index
      %c0_7 = arith.constant 0 : index
      %16 = vector.load %arg8[%c0, %c0_7] : memref<8x128xf32, #tpu.memory_space<vmem>>, vector<8x128xf32>
      %c0_8 = arith.constant 0 : index
      %c0_9 = arith.constant 0 : index
      %17 = vector.load %arg4[%c0_8, %c0_9] : memref<8x128xf32, #tpu.memory_space<vmem>>, vector<8x128xf32>
      %18 = math.absf %17 : vector<8x128xf32>
      %19 = arith.addf %16, %18 : vector<8x128xf32>
      %c0_10 = arith.constant 0 : index
      %c0_11 = arith.constant 0 : index
      %20 = vector.load %arg8[%c0_10, %c0_11] : memref<8x128xf32, #tpu.memory_space<vmem>>, vector<8x128xf32>
      tpu.vector_store %arg8[%c0_10, %c0_11], %19 {strides = array<i32>} : memref<8x128xf32, #tpu.memory_space<vmem>>, vector<8x128xf32>,
    } else {
    }
    %c0_i32_5 = arith.constant 0 : i32
    %13 = arith.cmpi eq, %arg1, %c0_i32_5 : i32
    %14 = arith.extui %13 : i1 to i32
    %c0_i32_6 = arith.constant 0 : i32
    %15 = arith.cmpi ne, %14, %c0_i32_6 : i32
    scf.if %15 {
      %c0 = arith.constant 0 : index
      %c0_7 = arith.constant 0 : index
      %16 = vector.load %arg7[%c0, %c0_7] : memref<16x128xf32, #tpu.memory_space<vmem>>, vector<16x128xf32>
      %17 = vector.shape_cast %16 : vector<16x128xf32> to vector<2x8x128xf32>
      %cst = arith.constant dense<0.000000e+00> : vector<8x128xf32>
      %18 = vector.multi_reduction <add>, %17, %cst [0] : vector<2x8x128xf32> to vector<8x128xf32>
      %c0_8 = arith.constant 0 : index
      %c0_9 = arith.constant 0 : index
      %c0_10 = arith.constant 0 : index
      %19 = vector.load %arg5[%c0_8, %c0_9, %c0_10] : memref<1x8x128xf32, #tpu.memory_space<vmem>>, vector<1x8x128xf32>
      %20 = vector.shape_cast %19 : vector<1x8x128xf32> to vector<8x128xf32>
      %21 = vector.shape_cast %18 : vector<8x128xf32> to vector<1x8x128xf32>
      tpu.vector_store %arg5[%c0_8, %c0_9, %c0_10], %21 {strides = array<i32>} : memref<1x8x128xf32, #tpu.memory_space<vmem>>, vector<1x8x128xf32>,
      %c0_11 = arith.constant 0 : index
      %c0_12 = arith.constant 0 : index
      %22 = vector.load %arg8[%c0_11, %c0_12] : memref<8x128xf32, #tpu.memory_space<vmem>>, vector<8x128xf32>
      %23 = vector.shape_cast %22 : vector<8x128xf32> to vector<1x8x128xf32>
      %cst_13 = arith.constant dense<0.000000e+00> : vector<8x128xf32>
      %24 = vector.multi_reduction <add>, %23, %cst_13 [0] : vector<1x8x128xf32> to vector<8x128xf32>
      %c0_14 = arith.constant 0 : index
      %c0_15 = arith.constant 0 : index
      %c0_16 = arith.constant 0 : index
      %25 = vector.load %arg6[%c0_14, %c0_15, %c0_16] : memref<1x8x128xf32, #tpu.memory_space<vmem>>, vector<1x8x128xf32>
      %26 = vector.shape_cast %25 : vector<1x8x128xf32> to vector<8x128xf32>
      %27 = vector.shape_cast %24 : vector<8x128xf32> to vector<1x8x128xf32>
      tpu.vector_store %arg6[%c0_14, %c0_15, %c0_16], %27 {strides = array<i32>} : memref<1x8x128xf32, #tpu.memory_space<vmem>>, vector<1x8x128xf32>,
    } else {
    }
    return
  }
  func.func @transform_0(%arg0: i32, %arg1: i32) -> (i32, i32) {
    %c1_i32 = arith.constant 1 : i32
    %0 = arith.muli %arg0, %c1_i32 : i32
    %1 = arith.addi %0, %arg1 : i32
    %c0_i32 = arith.constant 0 : i32
    %2 = arith.minsi %1, %c0_i32 : i32
    %c0_i32_0 = arith.constant 0 : i32
    %c0_i32_1 = arith.constant 0 : i32
    return %2, %c0_i32_0 : i32, i32
  }
  func.func @transform_1(%arg0: i32, %arg1: i32) -> (i32, i32) {
    %c1_i32 = arith.constant 1 : i32
    %0 = arith.muli %arg0, %c1_i32 : i32
    %1 = arith.addi %0, %arg1 : i32
    %c0_i32 = arith.constant 0 : i32
    %2 = arith.minsi %1, %c0_i32 : i32
    %c0_i32_0 = arith.constant 0 : i32
    %c0_i32_1 = arith.constant 0 : i32
    return %2, %c0_i32_0 : i32, i32
  }
  func.func @transform_2(%arg0: i32, %arg1: i32) -> (i32, i32) {
    %c1_i32 = arith.constant 1 : i32
    %0 = arith.muli %arg0, %c1_i32 : i32
    %1 = arith.addi %0, %arg1 : i32
    %c1_i32_0 = arith.constant 1 : i32
    %2 = arith.subi %1, %c1_i32_0 : i32
    %c0_i32 = arith.constant 0 : i32
    %c0_i32_1 = arith.constant 0 : i32
    %3 = arith.maxsi %c0_i32, %2 : i32
    %4 = arith.minsi %c0_i32_1, %3 : i32
    %c0_i32_2 = arith.constant 0 : i32
    %c0_i32_3 = arith.constant 0 : i32
    return %4, %c0_i32_2 : i32, i32
  }
  func.func @transform_3(%arg0: i32, %arg1: i32) -> (i32, i32, i32) {
    %c0_i32 = arith.constant 0 : i32
    %c0_i32_0 = arith.constant 0 : i32
    %c0_i32_1 = arith.constant 0 : i32
    return %arg0, %c0_i32, %c0_i32_0 : i32, i32, i32
  }
  func.func @transform_4(%arg0: i32, %arg1: i32) -> (i32, i32, i32) {
    %c0_i32 = arith.constant 0 : i32
    %c0_i32_0 = arith.constant 0 : i32
    %c0_i32_1 = arith.constant 0 : i32
    return %arg0, %c0_i32, %c0_i32_0 : i32, i32, i32
  }
}

</mosaic_0001>

<bundles_post_ra>
// kernel: custom_loss.1
= control target key start
LH: loop header
LB: loop body
LE: loop exit
PB: predicated region body
PF: predicated region fallthrough
CT: control target
= control target key end

     0   :  { %s643_s15 = smov 0   ;;  %s645_s16 = smov 0   ;;  %s703_s0 = inlined_call_operand.vmem [shape: f32[16,128], index: 0, kind: input, shape index: {}]   ;;  %s704_s1 = inlined_call_operand.vmem [shape: f32[16,128], index: 1, kind: input, shape index: {}]   ;;  %s705_s2 = inlined_call_operand.vmem [shape: f32[8,128], index: 2, kind: input, shape index: {}]   ;;  %s706_s3 = inlined_call_operand.vmem [shape: f32[2,8,128], index: 3, kind: output, shape index: {0}]   ;;  %s707_s4 = inlined_call_operand.vmem [shape: f32[2,8,128], index: 4, kind: output, shape index: {1}]  }
   0x1   :  { %s647_s17 = smov 0  }
   0x2 LB: > { %s27_s18 = sadd.s32 1, %s611_s16  ;;  %p543_p0 = scmp.ge.s32.totalorder %s615_s17, 1  ;;  %s615_s17 = sphi %s647_s17, %s15_s17   ;;  %s611_s16 = sphi %s645_s16, %s709_s16   ;;  %s607_s15 = sphi %s643_s15, %s708_s15  }
   0x3   : > { %p29_p1 = scmp.ge.s32.totalorder %s27_s18, 2  ;;  %p246_p2 = scmp.lt.s32.totalorder %s615_s17, 3 }
   0x5   : > { %s711_s18 = smov (%p29_p1, %s27_s18), 0  ;;  %p247_p3 = pnand %p543_p0, %p246_p2 }
   0x6   : > { %p297_p4 = scmp.lt.s32.totalorder (!%p247_p3), %s607_s15, 0  ;;  %p336_p5 = scmp.lt.s32.totalorder (!%p247_p3), %s607_s15, 1  ;;  %v617_v0 = vmov (!%p247_p3), 0.0  }
   0x7   : > { %250 = sbr.rel (%p247_p3) target bundleno = 67 (0x43), region = 32  ;;  %349 = vst [vmem:[#allocation2] sm:$0xff] (!%p247_p3), %v617_v0  ;;  %350 = vst [vmem:[#allocation2 + $0x8] sm:$0xff] (!%p247_p3), %v617_v0  ;;  %p557_p7 = scmp.ge.s32.totalorder (!%p247_p3), %s607_s15, 1 }
   0x8   : > { %351 = vst [vmem:[#allocation3] sm:$0xff] (!%p247_p3), %v617_v0 }
   0xe   : > { %s298_s19 = scalar_select %p297_p4, %s607_s15, 0 }
   0xf   : > { %s337_s20 = scalar_select %p336_p5, %s607_s15, 1 }
  0x10   : > { %s544_s21 = sshll.u32 %s298_s19, 1  ;;  %355 = sbr.rel (%p557_p7) target bundleno = 50 (0x32), region = 40  ;;  %v374_v26 = vld [vmem:[#allocation2] sm:$0xff] (!%p557_p7)  ;;  %v375_v29 = vld [vmem:[#allocation2 + $0x8] sm:$0xff] (!%p557_p7) }
  0x11   : > { %p300_p6 = scmp.lt.s32.totalorder %s544_s21, 1  ;;  %s555_s22 = sshll.u32 %s337_s20, 3 }
  0x12   : > { %s670_s25 = scalar_lea.vmem %s706_s3, %s555_s22  ;;  %s675_s28 = scalar_lea.vmem %s707_s4, %s555_s22 }
  0x13   : > { %s713_s21 = smov (!%p300_p6, %s544_s21), 1 }
  0x14   : > { %s545_s29 = sshll.u32 %s713_s21, 3 }
  0x15   : > { %s303_s6 = scalar_lea.vmem %s703_s0, %s545_s29  ;;  %s315_s9 = scalar_lea.vmem %s704_s1, %s545_s29 }
  0x16   : > { %v356_v1 = vld [vmem:[%s303_s6] sm:$0xff] (!%p557_p7)  ;;  %v357_v3 = vld [vmem:[%s303_s6 + $0x8] sm:$0xff] (!%p557_p7) }
  0x17   : > { %585 = vlog2.f32 %v356_v1  ;;  %v366_v2 = vsub.f32 1.0, %v356_v1  ;;  %v367_v4 = vsub.f32 1.0, %v357_v3  ;;  %v358_v6 = vld [vmem:[%s315_s9] sm:$0xff]  ;;  %v359_v9 = vld [vmem:[%s315_s9 + $0x8] sm:$0xff] }
  0x18   : > { %587 = vlog2.f32 %v357_v3  ;;  %v378_v15 = vsub.f32 1.0, %v358_v6  ;;  %v379_v18 = vsub.f32 1.0, %v359_v9 }
  0x19   : > { %589 = vlog2.f32 %v366_v2 }
  0x1a   : > { %591 = vlog2.f32 %v367_v4 }
  0x21   : > { %v586_v5 = vpop.eup %585 }
  0x22   : > { %v588_v7 = vpop.eup %587  ;;  %v361_v8 = vmul.f32 0.6931472, %v586_v5 }
  0x23   : > { %v590_v10 = vpop.eup %589  ;;  %v363_v11 = vmul.f32 0.6931472, %v588_v7 }
  0x24   : > { %v592_v12 = vpop.eup %591  ;;  %v364_v13 = vmax.f32 %v361_v8, -100.0  ;;  %v369_v14 = vmul.f32 0.6931472, %v590_v10 }
  0x25   : > { %v365_v16 = vmax.f32 %v363_v11, -100.0  ;;  %v371_v17 = vmul.f32 0.6931472, %v592_v12 }
  0x26   : > { %v372_v19 = vmax.f32 %v369_v14, -100.0  ;;  %v376_v20 = vmul.f32 %v364_v13, %v358_v6 }
  0x27   : > { %v373_v21 = vmax.f32 %v371_v17, -100.0  ;;  %v377_v22 = vmul.f32 %v365_v16, %v359_v9 }
  0x28   : > { %v380_v23 = vmul.f32 %v378_v15, %v372_v19 }
  0x29   : > { %v381_v24 = vmul.f32 %v379_v18, %v373_v21 }
  0x2a   : > { %v382_v25 = vadd.f32 %v380_v23, %v376_v20 }
  0x2b   : > { %v383_v27 = vadd.f32 %v381_v24, %v377_v22 }
  0x2c   : > { %v384_v28 = vsub.f32 0.0, %v382_v25 }
  0x2d   : > { %v385_v30 = vsub.f32 0.0, %v383_v27 }
  0x2e   : > { %v386_v31 = vadd.f32 %v384_v28, %v374_v26 }
  0x2f   : > { %v387_v32 = vadd.f32 %v385_v30, %v375_v29 }
  0x30   : > { %388 = vst [vmem:[#allocation2] sm:$0xff] %v386_v31 }
  0x31   : > { %389 = vst [vmem:[#allocation2 + $0x8] sm:$0xff] %v387_v32 }
  0x32 PF: > { %p391_p8 = scmp.lt.s32.totalorder %s607_s15, 2 }
  0x34   : > { %p392_p9 = pnand %p557_p7, %p391_p8 }
  0x35   : > { %v396_v33 = vld [vmem:[#allocation3] sm:$0xff] (!%p392_p9)  ;;  %v397_v34 = vld [vmem:[%s705_s2] sm:$0xff] (!%p392_p9) }
  0x36   : > { %395 = sbr.rel (%p392_p9) target bundleno = 61 (0x3d), region = 44  ;;  %v398_v35 = vand.u32 (!%p392_p9), 2147483647, %v397_v34 }
  0x38   : > { %v399_v36 = vadd.f32 (!%p392_p9), %v398_v35, %v396_v33 }
  0x3a   : > { %400 = vst [vmem:[#allocation3] sm:$0xff] (!%p392_p9), %v399_v36 }
  0x3d PF: > { %v404_v37 = vld [vmem:[#allocation2] sm:$0xff]  ;;  %v405_v38 = vld [vmem:[#allocation2 + $0x8] sm:$0xff] }
  0x3e   : > { %v406_v40 = vadd.f32 %v405_v38, %v404_v37 }
  0x40   : > { %407 = vst [vmem:[%s670_s25] sm:$0xff] %v406_v40 }
  0x41   : > { %v408_v39 = vld [vmem:[#allocation3] sm:$0xff] }
  0x42   : > { %410 = vst [vmem:[%s675_s28] sm:$0xff] %v408_v39 }
  0x43 PF: > { %s15_s17 = sadd.s32 1, %s615_s17   ;;  %s708_s15 = smov %s611_s16 }
  0x44   : > { %p12_p10 = scmp.ge.s32.totalorder %s15_s17, 4   ;;  %s709_s16 = smov %s711_s18 }
  0x46   :  { %14 = sbr.rel (!%p12_p10) target bundleno = 2 (0x2), region = 96 }

</bundles_post_ra>
